<compile_context>
chip_gen: v7x
topology: tpu7x:2x2x1
jax: 0.10.0
libtpu: 0.0.40
codegen_flags: <defaults>
</compile_context>

<pallas_src>
import functools

import jax
import jax.numpy as jnp
from jax import lax
from jax.experimental import pallas as pl
from jax.experimental.pallas import tpu as pltpu


# ---------------------------------------------------------------------------
# Hardware introspection (generation-aware VMEM budgets / bf16-EUP gating).
# ---------------------------------------------------------------------------

def _device_kind():
    try:
        return jax.devices()[0].device_kind.lower()
    except Exception:
        return ""


def _vmem_capacity_bytes():
    try:
        return int(pltpu.get_tpu_info().vmem_capacity_bytes)
    except Exception:
        kind = _device_kind()
        if "v7" in kind or "7x" in kind:
            return 64 * 1024 * 1024
        return 128 * 1024 * 1024


def _has_bf16_eup():
    # bf16 EUP/VPU exists on v6e and v7x; NOT on v5e.
    kind = _device_kind()
    return any(t in kind for t in ("v6", "v7", "7x"))


def _vmem_budget_and_limit():
    cap = _vmem_capacity_bytes()
    if cap >= 100 * 1024 * 1024:
        # v5e / v6e: 128 MiB per TensorCore -> use most of it.
        return 88 * 1024 * 1024, 100 * 1024 * 1024
    # v7x: 64 MiB per TensorCore -> leave headroom for compiler scratch.
    return 38 * 1024 * 1024, 52 * 1024 * 1024


# ---------------------------------------------------------------------------
# Tiling selection.
# ---------------------------------------------------------------------------

def _pick_normalize_tm(n, d_pad, mm_bytes, budget):
    # Pass 1 is HBM-bandwidth bound; biggest row tile that fits wins.
    per_row = 2 * d_pad * (4 + mm_bytes)          # double-buffered in + out
    if n * per_row <= budget // 2:
        return n
    row_mult = 16 if mm_bytes < 4 else 8
    for tm in (4096, 2048, 1024, 512, 256, 128, 64, 32, 16, 8):
        if tm % row_mult or n % tm:
            continue
        if tm * per_row <= budget // 2:
            return tm
    return n


def _pick_resident_tm(n, d_pad, mm_bytes, budget, exact_lse):
    row_mult = 16 if mm_bytes < 4 else 8
    n_tmp = 5 if exact_lse else 4                 # live f32 (tm, n) temporaries
    for tm in (1024, 512, 256, 128, 64, 32, 16, 8):
        if tm % row_mult or n % tm:
            continue
        est = (n_tmp * tm * n * 4
               + n * d_pad * mm_bytes             # resident keys (single-buffered)
               + 4 * tm * d_pad * mm_bytes        # double-buffered q + partner
               + 2 * tm * 128 * 4)                # double-buffered output block
        if est <= budget:
            return tm
    return None


def _pick_column_tiling(n, d_pad, mm_bytes, budget, exact_lse):
    row_mult = 16 if mm_bytes < 4 else 8
    n_tmp = 5 if exact_lse else 4
    for tm in (512, 256, 128, 64, 32, 16):
        if tm % row_mult or n % tm:
            continue
        for tk in (4096, 2048, 1024, 512, 256, 128):
            if n % tk:
                continue
            est = (n_tmp * tm * tk * 4
                   + 2 * tk * d_pad * mm_bytes    # double-buffered key blocks
                   + 4 * tm * d_pad * mm_bytes    # q + partner blocks
                   + 2 * tm * 128 * 4             # output block
                   + 4 * tm * 4)                  # m / l scratch
            if est <= budget:
                return tm, tk
    return None


def _choose_tiling(n, d_pad, mm_bytes, budget, exact_lse, override=None):
    if override is not None:
        mode, tm, tk = override
        assert mode in ("resident", "columns")
        assert n % tm == 0 and (tk is None or n % tk == 0)
        return mode, tm, tk
    tm = _pick_resident_tm(n, d_pad, mm_bytes, budget, exact_lse)
    if tm is not None and tm >= min(n, 128):
        return "resident", tm, None
    cols = _pick_column_tiling(n, d_pad, mm_bytes, budget, exact_lse)
    if cols is not None:
        return "columns", cols[0], cols[1]
    if tm is not None:
        return "resident", tm, None
    # Tiny / awkward N: single full block (exempt from the (8,128) tiling rule).
    return "resident", n, None


def _single_buffered_spec(block_shape, index_map):
    """BlockSpec for a block that never changes across the grid; request a
    single VMEM buffer (no point double-buffering a constant block)."""
    if hasattr(pl, "Buffered"):
        try:
            return pl.BlockSpec(block_shape, index_map,
                                pipeline_mode=pl.Buffered(1))
        except TypeError:
            pass
    return pl.BlockSpec(block_shape, index_map)


# ---------------------------------------------------------------------------
# Kernels.
# ---------------------------------------------------------------------------

def _normalize_kernel(z_ref, o_ref, *, inv_sqrt_temp):
    # z_ref: (tm1, Dp) f32 ; o_ref: (tm1, Dp) matmul dtype
    z = z_ref[...]
    sq = jnp.sum(z * z, axis=-1, keepdims=True)                 # (tm1, 1)
    inv = lax.rsqrt(jnp.maximum(sq, jnp.float32(1e-8)))         # EUP rsqrt
    o_ref[...] = (z * (inv * jnp.float32(inv_sqrt_temp))).astype(o_ref.dtype)


def _nt_xent_resident_kernel(q_ref, p_ref, k_ref, o_ref, *, exact_lse,
                             bf16_exp):
    # q_ref: (tm, Dp) this block's normalized rows (scaled by 1/sqrt(T))
    # p_ref: (tm, Dp) partner rows (row r pairs with (r + half_n) % N)
    # k_ref: (N, Dp)  all normalized rows, resident, single-buffered
    # o_ref: (tm, 128) per-row loss, lane-broadcast (unmasked stores)
    tm = q_ref.shape[0]
    n = k_ref.shape[0]

    q = q_ref[...]
    # Scaled cosine similarities on the MXU ('qd,kd->qk', same contraction as
    # production flash-attention kernels; no materialized key transpose).
    sim = lax.dot_general(q, k_ref[...],
                          dimension_numbers=(((1,), (1,)), ((), ())),
                          preferred_element_type=jnp.float32)

    qf = q.astype(jnp.float32)
    # Positive-pair logit: row-wise dot with the partner rows (O(tm*Dp)).
    pos = jnp.sum(qf * p_ref[...].astype(jnp.float32), axis=-1, keepdims=True)

    def _exp(x):
        if bf16_exp:
            return jnp.exp(x.astype(jnp.bfloat16)).astype(jnp.float32)
        return jnp.exp(x)

    if exact_lse:
        # Exact path: diagonal -inf mask (VPU-heavy; verification / tiny T).
        row_g = (pl.program_id(0) * tm
                 + lax.broadcasted_iota(jnp.int32, (tm, 1), 0))
        col_g = lax.broadcasted_iota(jnp.int32, (tm, n), 1)
        masked = jnp.where(col_g == row_g, -jnp.inf, sim)
        m = jnp.max(masked, axis=-1, keepdims=True)
        den = jnp.sum(_exp(masked - m), axis=-1, keepdims=True)
    else:
        # Fast path: unmasked LSE, then subtract the diagonal term.  For
        # normalized rows the diagonal is the row max, so exp(diag - m) ~= 1.
        m = jnp.max(sim, axis=-1, keepdims=True)
        diag = jnp.sum(qf * qf, axis=-1, keepdims=True)
        den = jnp.sum(_exp(sim - m), axis=-1, keepdims=True) - _exp(diag - m)
        den = jnp.maximum(den, jnp.float32(1e-30))

    loss = m + jnp.log(den) - pos
    o_ref[...] = jnp.broadcast_to(loss, (tm, o_ref.shape[1]))


def _nt_xent_columns_kernel(q_ref, p_ref, k_ref, o_ref, m_sc, l_sc, *,
                            exact_lse, bf16_exp):
    # Flash-style online LSE over key-column blocks.
    # q_ref: (tm, Dp)  p_ref: (tm, Dp)  k_ref: (tk, Dp)  o_ref: (tm, 128)
    # m_sc, l_sc: (tm, 1) f32 scratch accumulators.
    tm = q_ref.shape[0]
    tk = k_ref.shape[0]
    j = pl.program_id(1)

    @pl.when(j == 0)
    def _():
        m_sc[...] = jnp.full(m_sc.shape, -jnp.inf, jnp.float32)
        l_sc[...] = jnp.zeros(l_sc.shape, jnp.float32)

    q = q_ref[...]
    sim = lax.dot_general(q, k_ref[...],
                          dimension_numbers=(((1,), (1,)), ((), ())),
                          preferred_element_type=jnp.float32)

    if exact_lse:
        row_g = (pl.program_id(0) * tm
                 + lax.broadcasted_iota(jnp.int32, (tm, 1), 0))
        col_g = j * tk + lax.broadcasted_iota(jnp.int32, (tm, tk), 1)
        sim = jnp.where(col_g == row_g, -jnp.inf, sim)

    def _exp(x):
        if bf16_exp:
            return jnp.exp(x.astype(jnp.bfloat16)).astype(jnp.float32)
        return jnp.exp(x)

    m_prev = m_sc[...]
    m_new = jnp.maximum(m_prev, jnp.max(sim, axis=-1, keepdims=True))
    alpha = jnp.exp(m_prev - m_new)                      # f32; 0 at j == 0
    l_sc[...] = alpha * l_sc[...] + jnp.sum(_exp(sim - m_new), axis=-1,
                                            keepdims=True)
    m_sc[...] = m_new

    @pl.when(j == pl.num_programs(1) - 1)
    def _():
        qf = q.astype(jnp.float32)
        pos = jnp.sum(qf * p_ref[...].astype(jnp.float32), axis=-1,
                      keepdims=True)
        m = m_sc[...]
        den = l_sc[...]
        if not exact_lse:
            diag = jnp.sum(qf * qf, axis=-1, keepdims=True)
            den = den - _exp(diag - m)
            den = jnp.maximum(den, jnp.float32(1e-30))
        loss = m + jnp.log(den) - pos
        o_ref[...] = jnp.broadcast_to(loss, (tm, o_ref.shape[1]))


# ---------------------------------------------------------------------------
# Wrapper.
# ---------------------------------------------------------------------------

def nt_xent_loss(z_i, z_j, temperature, batch_size, world_size=1,
                 matmul_dtype=jnp.bfloat16, exact_lse=None, tiling=None):
    """Pallas implementation of NT_Xent.forward (single-host path).

    z_i, z_j: (batch_size * world_size, D) arrays.  Returns a scalar f32 loss.

    matmul_dtype=jnp.bfloat16 is the fast path (bf16 MXU operands, f32
    accumulation; bf16 EUP exp on v6e/v7x).  jnp.float32 is the exact
    verification path (note: ~3-4x more MXU time, especially on v5e).
    exact_lse=None -> auto: float32 uses the diagonal-masked exact LSE,
    bf16 uses the unmasked LSE + diagonal subtraction (except for very small
    temperature, where the subtraction could cancel).
    tiling: optional override ("resident", tm, None) or ("columns", tm, tk).
    """
    # TODO(synk): world_size > 1 in the reference uses a distributed
    # all-gather (GatherLayer); single-host semantics are reproduced here.
    z = jnp.concatenate([z_i, z_j], axis=0).astype(jnp.float32)   # (N, D)
    n, d = z.shape
    half_n = batch_size * world_size
    assert n == 2 * half_n, "z_i/z_j must each have batch_size*world_size rows"

    # Pad the feature (lane) axis once to a multiple of 128; zero columns do
    # not change dot products or norms.
    d_pad = ((d + 127) // 128) * 128
    if d_pad != d:
        z = jnp.pad(z, ((0, 0), (0, d_pad - d)))

    mm_bytes = jnp.dtype(matmul_dtype).itemsize
    budget, vmem_limit = _vmem_budget_and_limit()
    if exact_lse is None:
        exact_lse = (jnp.dtype(matmul_dtype) == jnp.float32
                     or float(temperature) < 0.05)
    bf16_exp = (jnp.dtype(matmul_dtype) != jnp.float32) and _has_bf16_eup()

    # ---- pass 1: row-normalize, fold 1/sqrt(T), cast to matmul dtype -------
    inv_sqrt_temp = 1.0 / (float(temperature) ** 0.5)
    tm1 = _pick_normalize_tm(n, d_pad, mm_bytes, budget)
    z_hat = pl.pallas_call(
        functools.partial(_normalize_kernel, inv_sqrt_temp=inv_sqrt_temp),
        out_shape=jax.ShapeDtypeStruct((n, d_pad), matmul_dtype),
        grid=(n // tm1,),
        in_specs=[pl.BlockSpec((tm1, d_pad), lambda i: (i, 0))],
        out_specs=pl.BlockSpec((tm1, d_pad), lambda i: (i, 0)),
        compiler_params=pltpu.CompilerParams(
            dimension_semantics=("parallel",),
            vmem_limit_bytes=vmem_limit),
    )(z)

    # ---- pass 2: per-row loss ----------------------------------------------
    mode, tm, tk = _choose_tiling(n, d_pad, mm_bytes, budget, exact_lse, tiling)
    num_blocks = n // tm

    # Partner rows (row r pairs with row (r + half_n) % n).  When half_n is a
    # multiple of tm the partner block is a shifted block of z_hat, so we pass
    # z_hat twice with a shifted index_map (no extra HBM traffic, no roll).
    # Only tiny / awkward N falls back to an explicit roll.
    if half_n % tm == 0:
        partner = z_hat
        shift = (half_n // tm) % num_blocks
    else:
        partner = jnp.roll(z_hat, shift=-half_n, axis=0)
        shift = 0

    if mode == "resident":
        q_spec = pl.BlockSpec((tm, d_pad), lambda i: (i, 0))
        p_spec = pl.BlockSpec((tm, d_pad),
                              lambda i: ((i + shift) % num_blocks, 0))
        k_spec = _single_buffered_spec((n, d_pad), lambda i: (0, 0))
        per_row = pl.pallas_call(
            functools.partial(_nt_xent_resident_kernel,
                              exact_lse=exact_lse, bf16_exp=bf16_exp),
            out_shape=jax.ShapeDtypeStruct((n, 128), jnp.float32),
            grid=(num_blocks,),
            in_specs=[q_spec, p_spec, k_spec],
            out_specs=pl.BlockSpec((tm, 128), lambda i: (i, 0)),
            compiler_params=pltpu.CompilerParams(
                dimension_semantics=("parallel",),
                vmem_limit_bytes=vmem_limit),
        )(z_hat, partner, z_hat)
    else:
        num_col_blocks = n // tk
        q_spec = pl.BlockSpec((tm, d_pad), lambda i, j: (i, 0))
        p_spec = pl.BlockSpec((tm, d_pad),
                              lambda i, j: ((i + shift) % num_blocks, 0))
        k_spec = pl.BlockSpec((tk, d_pad), lambda i, j: (j, 0))
        per_row = pl.pallas_call(
            functools.partial(_nt_xent_columns_kernel,
                              exact_lse=exact_lse, bf16_exp=bf16_exp),
            out_shape=jax.ShapeDtypeStruct((n, 128), jnp.float32),
            grid=(num_blocks, num_col_blocks),
            in_specs=[q_spec, p_spec, k_spec],
            out_specs=pl.BlockSpec((tm, 128), lambda i, j: (i, 0)),
            scratch_shapes=[pltpu.VMEM((tm, 1), jnp.float32),
                            pltpu.VMEM((tm, 1), jnp.float32)],
            compiler_params=pltpu.CompilerParams(
                dimension_semantics=("parallel", "arbitrary"),
                vmem_limit_bytes=vmem_limit),
        )(z_hat, partner, z_hat)

    return jnp.sum(per_row[:, 0]) / jnp.float32(n)


# ---------------------------------------------------------------------------
# Pure-JAX reference + self-test.
# ---------------------------------------------------------------------------

def _nt_xent_reference(z_i, z_j, temperature, batch_size, world_size=1):
    """Pure-JAX reference mirroring the PyTorch module."""
    z = jnp.concatenate([z_i, z_j], axis=0).astype(jnp.float32)
    n = z.shape[0]
    half_n = batch_size * world_size
    norm = jnp.sqrt(jnp.sum(z * z, axis=-1, keepdims=True))
    sim = (z @ z.T) / jnp.maximum(norm * norm.T, 1e-8) / temperature
    idx = jnp.arange(n)
    pos = sim[idx, (idx + half_n) % n]
    masked = jnp.where(jnp.eye(n, dtype=bool), -jnp.inf, sim)
    lse = jax.scipy.special.logsumexp(masked, axis=-1)
    return jnp.sum(lse - pos) / n


if __name__ == "__main__":
    temperature = 0.5
    key = jax.random.PRNGKey(0)
    k1, k2, k3, k4 = jax.random.split(key, 4)

    # --- small, spec-sized test (auto tiling -> resident-keys path) ---------
    batch_size, dim = 4, 32
    z_i = jax.random.normal(k1, (batch_size, dim), jnp.float32)
    z_j = jax.random.normal(k2, (batch_size, dim), jnp.float32)
    ref = _nt_xent_reference(z_i, z_j, temperature, batch_size)

    loss_f32 = jax.block_until_ready(
        nt_xent_loss(z_i, z_j, temperature, batch_size,
                     matmul_dtype=jnp.float32))
    assert jnp.allclose(loss_f32, ref, rtol=1e-5, atol=1e-5), (loss_f32, ref)

    loss_bf16 = jax.block_until_ready(
        nt_xent_loss(z_i, z_j, temperature, batch_size,
                     matmul_dtype=jnp.bfloat16))
    assert jnp.allclose(loss_bf16, ref, rtol=5e-2, atol=5e-2), (loss_bf16, ref)

    # --- larger test: aligned shifted-partner resident path and the
    #     column-blocked online-LSE fallback ---------------------------------
    batch_size2, dim2 = 64, 48
    z_i2 = jax.random.normal(k3, (batch_size2, dim2), jnp.float32)
    z_j2 = jax.random.normal(k4, (batch_size2, dim2), jnp.float32)
    ref2 = _nt_xent_reference(z_i2, z_j2, temperature, batch_size2)

    loss_res = jax.block_until_ready(
        nt_xent_loss(z_i2, z_j2, temperature, batch_size2,
                     matmul_dtype=jnp.bfloat16,
                     tiling=("resident", 64, None)))
    assert jnp.allclose(loss_res, ref2, rtol=5e-2, atol=5e-2), (loss_res, ref2)

    loss_col_f32 = jax.block_until_ready(
        nt_xent_loss(z_i2, z_j2, temperature, batch_size2,
                     matmul_dtype=jnp.float32,
                     tiling=("columns", 64, 64)))
    assert jnp.allclose(loss_col_f32, ref2, rtol=1e-4, atol=1e-4), \
        (loss_col_f32, ref2)

    loss_col_bf16 = jax.block_until_ready(
        nt_xent_loss(z_i2, z_j2, temperature, batch_size2,
                     matmul_dtype=jnp.bfloat16,
                     tiling=("columns", 64, 64)))
    assert jnp.allclose(loss_col_bf16, ref2, rtol=5e-2, atol=5e-2), \
        (loss_col_bf16, ref2)

    print("KERNEL_OK")
</pallas_src>

<mosaic_0001>
module attributes {stable_mosaic.version = 11 : i64} {
  func.func @_normalize_kernel(%arg0: i32, %arg1: memref<8x128xf32, #tpu.memory_space<vmem>>, %arg2: memref<8x128xf32, #tpu.memory_space<vmem>>) attributes {dimension_semantics = [#tpu.dimension_semantics<parallel>], iteration_bounds = array<i64: 1>, scalar_prefetch = 0 : i64, scratch_operands = 0 : i64, tpu.core_type = #tpu.core_type<tc>, window_params = [{transform_indices = @transform_0, window_bounds = array<i64: 8, 128>}, {transform_indices = @transform_1, window_bounds = array<i64: 8, 128>}]} {
    %c0 = arith.constant 0 : index
    %c0_0 = arith.constant 0 : index
    %0 = vector.load %arg1[%c0, %c0_0] : memref<8x128xf32, #tpu.memory_space<vmem>>, vector<8x128xf32>
    %1 = arith.mulf %0, %0 : vector<8x128xf32>
    %cst = arith.constant dense<0.000000e+00> : vector<8xf32>
    %2 = vector.multi_reduction <add>, %1, %cst [1] : vector<8x128xf32> to vector<8xf32>
    %3 = vector.shape_cast %2 : vector<8xf32> to vector<8x1xf32>
    %cst_1 = arith.constant 9.99999993E-9 : f32
    %4 = vector.broadcast %cst_1 : f32 to vector<8x1xf32>
    %5 = arith.maximumf %3, %4 : vector<8x1xf32>
    %6 = math.rsqrt %5 : vector<8x1xf32>
    %cst_2 = arith.constant 1.41421354 : f32
    %7 = vector.broadcast %cst_2 : f32 to vector<8x1xf32>
    %8 = arith.mulf %6, %7 : vector<8x1xf32>
    %9 = vector.broadcast %8 : vector<8x1xf32> to vector<8x128xf32>
    %10 = arith.mulf %0, %9 : vector<8x128xf32>
    %c0_3 = arith.constant 0 : index
    %c0_4 = arith.constant 0 : index
    %11 = vector.load %arg2[%c0_3, %c0_4] : memref<8x128xf32, #tpu.memory_space<vmem>>, vector<8x128xf32>
    tpu.vector_store %arg2[%c0_3, %c0_4], %10 {strides = array<i32>} : memref<8x128xf32, #tpu.memory_space<vmem>>, vector<8x128xf32>,
    return
  }
  func.func @transform_0(%arg0: i32) -> (i32, i32) {
    %c0_i32 = arith.constant 0 : i32
    %c0_i32_0 = arith.constant 0 : i32
    return %arg0, %c0_i32 : i32, i32
  }
  func.func @transform_1(%arg0: i32) -> (i32, i32) {
    %c0_i32 = arith.constant 0 : i32
    %c0_i32_0 = arith.constant 0 : i32
    return %arg0, %c0_i32 : i32, i32
  }
}

</mosaic_0001>

<bundles_post_ra>
// kernel: tpu_custom_call.1
= control target key start
LH: loop header
LB: loop body
LE: loop exit
PB: predicated region body
PF: predicated region fallthrough
CT: control target
= control target key end

     0   :  { %6 = vsyncpa [#allocation3], 0  ;;  %s133_s0 = inlined_call_operand.hbm [shape: f32[8,128], index: 0, kind: input, shape index: {}]   ;;  %s134_s1 = inlined_call_operand.hbm [shape: f32[8,128], index: 1, kind: output, shape index: {}]  }
   0x1   :  { %7 = vsyncpa [#allocation4], 0  ;;  %s97_s6 = smov [#allocation2]   ;;  %s49_s10 = scalar_lea.hbm %s133_s0, 128 }
   0x2   :  { %s14_s7 = sshll.u32 %s97_s6, 4  ;;  %p50_p0 = scmp.ne.s32.totalorder %s133_s0, %s49_s10  ;;  %s15_s7 = int_to_ptr.vmem [resolvable:$true] %s14_s7 }
   0x3   :  { %p53_p1 = scmp.lt.u32.totalorder %s49_s10, %s133_s0 }
   0x5   :  { %p55_p2 = pnand %p53_p1, %p50_p0 }
   0x7   :  { %58 = shalt.err (!%p55_p2)
}
   0x8   :  { %s59_s15 = scalar_lea.vmem %s15_s7, 128  ;;  %p64_p4 = scmp.lt.s32.totalorder %s15_s7, %s15_s7 }
   0x9   :  { %p60_p3 = scmp.ne.s32.totalorder %s15_s7, %s59_s15  ;;  %p65_p5 = scmp.lt.s32.totalorder %s59_s15, %s59_s15 }
   0xb   :  { %p66_p6 = por %p65_p5, %p64_p4 }
   0xd   :  { %p67_p7 = pnand %p66_p6, %p60_p3 }
   0xf   :  { %70 = shalt.err (!%p67_p7)
}
  0x10   :  { %17 = dma.hbm_to_vmem [thread:$0]  %s133_s0, 128, %s15_s7, [#allocation3]  }
  0x11   :  { %93 = dma.done.wait [#allocation3], 128  }
  0x12   :  { %94 = vsyncadd [#allocation3], 4294967168  ;;  %v21_v0 = vld [vmem:[#allocation2] sm:$0xff]  ;;  %s98_s18 = smov [#allocation5]  }
  0x13   :  { %v22_v1 = vmul.f32 %v21_v0, %v21_v0  ;;  %s36_s19 = sshll.u32 %s98_s18, 4  ;;  %s37_s19 = int_to_ptr.vmem [resolvable:$true] %s36_s19 }
  0x14   :  { %s71_s20 = scalar_lea.vmem %s37_s19, 128  ;;  %p76_p9 = scmp.lt.s32.totalorder %s37_s19, %s37_s19 }
  0x15   :  { %23 = vadd.xlane.f32.xlu0 %v22_v1  ;;  %p72_p8 = scmp.ne.s32.totalorder %s37_s19, %s71_s20  ;;  %p77_p10 = scmp.lt.s32.totalorder %s71_s20, %s71_s20 }
  0x17   :  { %p78_p11 = por %p77_p10, %p76_p9 }
  0x19   :  { %p79_p12 = pnand %p78_p11, %p72_p8 }
  0xa2   :  { %v24_v2 = vpop.xlane.xlu0 %23 }
  0xa3   :  { %v25_v3 = vmax.f32 %v24_v2, 1e-08 }
  0xa5   :  { %47 = vrsqrt.f32 %v25_v3 }
  0xaf   :  { %v48_v4 = vpop.eup %47 }
  0xb0   :  { %v27_v5 = vmul.f32 1.4142135, %v48_v4 }
  0xb2   :  { %v28_v6 = vmul.f32 %v27_v5, %v21_v0 }
  0xb4   :  { %29 = vst [vmem:[#allocation5] sm:$0xff] %v28_v6 }
  0xb5   :  { %82 = shalt.err (!%p79_p12)
}
  0xb6   :  { %s83_s22 = scalar_lea.hbm %s134_s1, 128 }
  0xb7   :  { %p84_p13 = scmp.ne.s32.totalorder %s134_s1, %s83_s22  ;;  %p87_p0 = scmp.lt.u32.totalorder %s83_s22, %s134_s1 }
  0xb9   :  { %p89_p1 = pnand %p87_p0, %p84_p13 }
  0xbb   :  { %92 = shalt.err (!%p89_p1)
}
  0xbc   :  { %39 = dma.vmem_to_hbm [thread:$0]  %s37_s19, 128, %s134_s1, [#allocation4]  }
  0xbd   :  { %95 = dma.done.wait [#allocation4], 128  }
  0xbe   :  { %96 = vsyncadd [#allocation4], 4294967168 }
  0xbf   :  { %43 = vsyncpa [#allocation3], 1 }
  0xc0   :  { %44 = vsyncpa [#allocation4], 1 }

</bundles_post_ra>
